<compile_context>
chip_gen: v6e
topology: v6e:2x2x1
jax: 0.10.0
libtpu: 0.0.40
codegen_flags: <defaults>
</compile_context>

<pallas_src>
import jax
import jax.numpy as jnp
from jax import lax
from jax.experimental import pallas as pl
from jax.experimental.pallas import tpu as pltpu

H = 128        # hidden width of fc1/fc2
OUT = 3        # fc3 logits
OUT_SUB = 8    # fc3 rows padded to one sublane group (transposed output)
LANE = 128


def _round_up(n, m):
    return ((n + m - 1) // m) * m


def _cdiv(a, b):
    return -(-a // b)


def ffnn_kernel(x_ref, w1_ref, w2_ref, w3t_ref, vec_ref, b3_ref, o_ref):
    # x_ref: [TB, D_in] f32 -> cast to bf16 in-kernel (fuses host-side cast).
    x = x_ref[...].astype(jnp.bfloat16)

    shift1 = vec_ref[0:1, :]     # folded bn1(b1) shift, f32 [1, H]
    shift2 = vec_ref[1:2, :]     # folded bn2(b2) shift, f32 [1, H]
    b3 = b3_ref[...]             # fc3 bias column, f32 [OUT_SUB, 1]

    # fc1 (+ folded bn1) + relu   -- bf16 MXU matmul, f32 accumulate/epilogue
    h1 = jnp.dot(x, w1_ref[...], preferred_element_type=jnp.float32)
    x1 = jnp.maximum(h1 + shift1, 0.0)                        # [TB, H] f32

    # fc2 (+ folded bn2) + relu, residual add of x1
    h2 = jnp.dot(x1.astype(jnp.bfloat16), w2_ref[...],
                 preferred_element_type=jnp.float32)
    x2 = jnp.maximum(h2 + shift2, 0.0) + x1                   # [TB, H] f32

    # (dropout is identity in eval mode)

    # fc3, transposed output: [OUT_SUB, H] . [TB, H]^T -> [OUT_SUB, TB]
    # Narrow 8-sublane store; batch stays on the lane axis (lane-dense for
    # multi-tile grids where TB is a multiple of 128).
    out_t = lax.dot_general(
        w3t_ref[...], x2.astype(jnp.bfloat16),
        dimension_numbers=(((1,), (1,)), ((), ())),
        preferred_element_type=jnp.float32)
    o_ref[...] = out_t + b3


def _tiling(B, block_b):
    """Pick (TB, B_pad, num_tiles): minimize last-tile padding, keep >= 2
    (even) grid steps for large B so the batch axis shards across v7x cores."""
    num_tiles = _cdiv(B, block_b)
    if num_tiles == 1 and B >= 512:
        num_tiles = 2                              # let both v7x TCs work
    if num_tiles > 1:
        if num_tiles % 2:
            num_tiles += 1                         # even split across 2 cores
        TB = _round_up(_cdiv(B, num_tiles), LANE)  # lane-dense output tiles
    else:
        TB = _round_up(B, 8)                       # single tile: minimal pad
    return TB, TB * num_tiles, num_tiles


def ffnn_forward(x, params, *, block_b=2048):
    """x: [B, D_in] float32. params: dict from init_params (BN pre-folded)."""
    B, D_in = x.shape
    TB, B_pad, num_tiles = _tiling(B, block_b)

    if B_pad != B:
        x = jnp.pad(x, ((0, B_pad - B), (0, 0)))   # single pad op, f32

    # VMEM budget: double-buffered x / out tiles + resident weights/vectors.
    est = (2 * TB * D_in * 4 + 2 * OUT_SUB * TB * 4
           + 2 * (D_in * H + H * H + OUT_SUB * H) * 2
           + 2 * (2 * H + OUT_SUB) * 4)
    cp_kwargs = dict(dimension_semantics=("parallel",))
    if est > 28 * 1024 * 1024:                     # exceed 32 MiB scoped default
        cp_kwargs["vmem_limit_bytes"] = min(2 * est, 60 * 1024 * 1024)

    out_t = pl.pallas_call(
        ffnn_kernel,
        out_shape=jax.ShapeDtypeStruct((OUT_SUB, B_pad), jnp.float32),
        grid_spec=pltpu.PrefetchScalarGridSpec(
            num_scalar_prefetch=0,
            grid=(num_tiles,),
            in_specs=[
                # batch-tiled activation stream (f32, cast in-kernel)
                pl.BlockSpec((TB, D_in), lambda i: (i, 0)),
                # VMEM-resident weights / vectors (constant index_maps)
                pl.BlockSpec((D_in, H), lambda i: (0, 0)),       # w1 (folded)
                pl.BlockSpec((H, H), lambda i: (0, 0)),          # w2 (folded)
                pl.BlockSpec((OUT_SUB, H), lambda i: (0, 0)),    # w3^T (8-row pad)
                pl.BlockSpec((2, H), lambda i: (0, 0)),          # shift1 / shift2
                pl.BlockSpec((OUT_SUB, 1), lambda i: (0, 0)),    # b3 column
            ],
            out_specs=pl.BlockSpec((OUT_SUB, TB), lambda i: (0, i)),
        ),
        compiler_params=pltpu.CompilerParams(**cp_kwargs),
    )(x, params["w1"], params["w2"], params["w3t"], params["vecs"],
      params["b3_col"])

    # Tiny slice + transpose: padded output is only OUT_SUB x B_pad f32.
    return out_t[:OUT, :B].T


def init_params(key, input_size):
    eps = 1e-5
    ks = jax.random.split(key, 6)

    # Linear weights ([in, out] layout) + biases
    w1 = jax.random.normal(ks[0], (input_size, H), jnp.float32) * 0.1
    b1 = jax.random.normal(ks[1], (1, H), jnp.float32) * 0.01
    w2 = jax.random.normal(ks[2], (H, H), jnp.float32) * 0.1
    b2 = jax.random.normal(ks[3], (1, H), jnp.float32) * 0.01
    w3 = jax.random.normal(ks[4], (H, OUT), jnp.float32) * 0.1
    b3 = jax.random.normal(ks[5], (1, OUT), jnp.float32) * 0.01

    # BatchNorm1d params at PyTorch defaults (inference mode):
    # gamma=1, beta=0, running_mean=0, running_var=1
    gamma1 = jnp.ones((1, H)); beta1 = jnp.zeros((1, H))
    rmean1 = jnp.zeros((1, H)); rvar1 = jnp.ones((1, H))
    gamma2 = jnp.ones((1, H)); beta2 = jnp.zeros((1, H))
    rmean2 = jnp.zeros((1, H)); rvar2 = jnp.ones((1, H))

    # Fold BN into per-feature scale/shift, then fold the scale into weights.
    s1 = gamma1 / jnp.sqrt(rvar1 + eps); t1 = beta1 - rmean1 * s1
    s2 = gamma2 / jnp.sqrt(rvar2 + eps); t2 = beta2 - rmean2 * s2

    w1f = w1 * s1                       # [D_in, H] * [1, H]
    shift1 = b1 * s1 + t1               # [1, H]
    w2f = w2 * s2
    shift2 = b2 * s2 + t2

    # fc3 stored pre-transposed and padded to 8 sublanes: [OUT_SUB, H].
    w3t = jnp.zeros((OUT_SUB, H), jnp.float32).at[:OUT, :].set(w3.T)
    b3_col = jnp.zeros((OUT_SUB, 1), jnp.float32).at[:OUT, 0].set(b3[0])

    # One resident (2, H) f32 buffer for the two per-feature shift vectors.
    vecs = jnp.concatenate([shift1, shift2], axis=0)

    return {
        # kernel params (matmul operands bf16, epilogue vectors f32)
        "w1": w1f.astype(jnp.bfloat16),
        "w2": w2f.astype(jnp.bfloat16),
        "w3t": w3t.astype(jnp.bfloat16),
        "vecs": vecs,
        "b3_col": b3_col,
        # f32 copies kept for the pure-JAX reference
        "shift1": shift1, "shift2": shift2,
    }


def ffnn_reference(x, p):
    """Pure-JAX reference with the same bf16-operand / f32-accumulate recipe."""
    bf = jnp.bfloat16
    h1 = jnp.dot(x.astype(bf), p["w1"], preferred_element_type=jnp.float32)
    x1 = jnp.maximum(h1 + p["shift1"], 0.0)
    h2 = jnp.dot(x1.astype(bf), p["w2"], preferred_element_type=jnp.float32)
    x2 = jnp.maximum(h2 + p["shift2"], 0.0) + x1
    out_t = jnp.dot(p["w3t"], x2.astype(bf).T,
                    preferred_element_type=jnp.float32) + p["b3_col"]
    return out_t[:OUT, :].T


if __name__ == "__main__":
    key = jax.random.PRNGKey(0)
    k_x, k_p = jax.random.split(key)

    B, INPUT_SIZE = 8, 32
    x = jax.random.normal(k_x, (B, INPUT_SIZE), jnp.float32)
    params = init_params(k_p, INPUT_SIZE)

    out = jax.block_until_ready(ffnn_forward(x, params))
    ref = ffnn_reference(x, params)

    assert out.shape == (B, OUT), out.shape
    assert jnp.allclose(out, ref, atol=2e-3, rtol=2e-3), "mismatch vs reference"

    print("KERNEL_OK")
</pallas_src>

<mosaic_0001>
module attributes {stable_mosaic.version = 11 : i64} {
  func.func @ffnn_kernel(%arg0: i32, %arg1: memref<8x32xf32, #tpu.memory_space<vmem>>, %arg2: memref<32x128xbf16, #tpu.memory_space<vmem>>, %arg3: memref<128x128xbf16, #tpu.memory_space<vmem>>, %arg4: memref<8x128xbf16, #tpu.memory_space<vmem>>, %arg5: memref<2x128xf32, #tpu.memory_space<vmem>>, %arg6: memref<8x1xf32, #tpu.memory_space<vmem>>, %arg7: memref<8x8xf32, #tpu.memory_space<vmem>>) attributes {dimension_semantics = [#tpu.dimension_semantics<parallel>], iteration_bounds = array<i64: 1>, scalar_prefetch = 0 : i64, scratch_operands = 0 : i64, tpu.core_type = #tpu.core_type<tc>, window_params = [{transform_indices = @transform_0, window_bounds = array<i64: 8, 32>}, {pipeline_mode = #tpu.pipeline_mode<synchronous>, transform_indices = @transform_1, window_bounds = array<i64: 32, 128>}, {pipeline_mode = #tpu.pipeline_mode<synchronous>, transform_indices = @transform_2, window_bounds = array<i64: 128, 128>}, {pipeline_mode = #tpu.pipeline_mode<synchronous>, transform_indices = @transform_3, window_bounds = array<i64: 8, 128>}, {pipeline_mode = #tpu.pipeline_mode<synchronous>, transform_indices = @transform_4, window_bounds = array<i64: 2, 128>}, {pipeline_mode = #tpu.pipeline_mode<synchronous>, transform_indices = @transform_5, window_bounds = array<i64: 8, 1>}, {transform_indices = @transform_6, window_bounds = array<i64: 8, 8>}]} {
    %c0 = arith.constant 0 : index
    %c0_0 = arith.constant 0 : index
    %0 = vector.load %arg1[%c0, %c0_0] : memref<8x32xf32, #tpu.memory_space<vmem>>, vector<8x32xf32>
    %1 = arith.truncf %0 : vector<8x32xf32> to vector<8x32xbf16>
    %c0_1 = arith.constant 0 : index
    %c0_2 = arith.constant 0 : index
    %2 = vector.load %arg5[%c0_1, %c0_2] : memref<2x128xf32, #tpu.memory_space<vmem>>, vector<1x128xf32>
    %c1 = arith.constant 1 : index
    %c0_3 = arith.constant 0 : index
    %3 = vector.load %arg5[%c1, %c0_3] : memref<2x128xf32, #tpu.memory_space<vmem>>, vector<1x128xf32>
    %c0_4 = arith.constant 0 : index
    %c0_5 = arith.constant 0 : index
    %4 = vector.load %arg6[%c0_4, %c0_5] : memref<8x1xf32, #tpu.memory_space<vmem>>, vector<8x1xf32>
    %c0_6 = arith.constant 0 : index
    %c0_7 = arith.constant 0 : index
    %5 = vector.load %arg2[%c0_6, %c0_7] : memref<32x128xbf16, #tpu.memory_space<vmem>>, vector<32x128xbf16>
    %cst = arith.constant dense<0.000000e+00> : vector<8x128xf32>
    %6 = tpu.matmul %1, %5, %cst {dimension_numbers = #tpu.dot_dimension_numbers<[1], [0], [0], [1], [0, 0, 1, 1], [], []>} : vector<8x32xbf16>, vector<32x128xbf16>, vector<8x128xf32> -> vector<8x128xf32>
    %7 = vector.broadcast %2 : vector<1x128xf32> to vector<8x128xf32>
    %8 = arith.addf %6, %7 : vector<8x128xf32>
    %cst_8 = arith.constant 0.000000e+00 : f32
    %9 = vector.broadcast %cst_8 : f32 to vector<8x128xf32>
    %10 = arith.maximumf %8, %9 : vector<8x128xf32>
    %11 = arith.truncf %10 : vector<8x128xf32> to vector<8x128xbf16>
    %c0_9 = arith.constant 0 : index
    %c0_10 = arith.constant 0 : index
    %12 = vector.load %arg3[%c0_9, %c0_10] : memref<128x128xbf16, #tpu.memory_space<vmem>>, vector<128x128xbf16>
    %cst_11 = arith.constant dense<0.000000e+00> : vector<8x128xf32>
    %13 = tpu.matmul %11, %12, %cst_11 {dimension_numbers = #tpu.dot_dimension_numbers<[1], [0], [0], [1], [0, 0, 1, 1], [], []>} : vector<8x128xbf16>, vector<128x128xbf16>, vector<8x128xf32> -> vector<8x128xf32>
    %14 = vector.broadcast %3 : vector<1x128xf32> to vector<8x128xf32>
    %15 = arith.addf %13, %14 : vector<8x128xf32>
    %cst_12 = arith.constant 0.000000e+00 : f32
    %16 = vector.broadcast %cst_12 : f32 to vector<8x128xf32>
    %17 = arith.maximumf %15, %16 : vector<8x128xf32>
    %18 = arith.addf %17, %10 : vector<8x128xf32>
    %c0_13 = arith.constant 0 : index
    %c0_14 = arith.constant 0 : index
    %19 = vector.load %arg4[%c0_13, %c0_14] : memref<8x128xbf16, #tpu.memory_space<vmem>>, vector<8x128xbf16>
    %20 = arith.truncf %18 : vector<8x128xf32> to vector<8x128xbf16>
    %cst_15 = arith.constant dense<0.000000e+00> : vector<8x8xf32>
    %21 = tpu.matmul %19, %20, %cst_15 {dimension_numbers = #tpu.dot_dimension_numbers<[1], [1], [0], [0], [0, 0, 1, 0], [], []>} : vector<8x128xbf16>, vector<8x128xbf16>, vector<8x8xf32> -> vector<8x8xf32>
    %22 = vector.broadcast %4 : vector<8x1xf32> to vector<8x8xf32>
    %23 = arith.addf %21, %22 : vector<8x8xf32>
    %c0_16 = arith.constant 0 : index
    %c0_17 = arith.constant 0 : index
    %24 = vector.load %arg7[%c0_16, %c0_17] : memref<8x8xf32, #tpu.memory_space<vmem>>, vector<8x8xf32>
    tpu.vector_store %arg7[%c0_16, %c0_17], %23 {strides = array<i32>} : memref<8x8xf32, #tpu.memory_space<vmem>>, vector<8x8xf32>,
    return
  }
  func.func @transform_0(%arg0: i32) -> (i32, i32) {
    %c0_i32 = arith.constant 0 : i32
    %c0_i32_0 = arith.constant 0 : i32
    return %arg0, %c0_i32 : i32, i32
  }
  func.func @transform_1(%arg0: i32) -> (i32, i32) {
    %c0_i32 = arith.constant 0 : i32
    %c0_i32_0 = arith.constant 0 : i32
    %c0_i32_1 = arith.constant 0 : i32
    return %c0_i32, %c0_i32_0 : i32, i32
  }
  func.func @transform_2(%arg0: i32) -> (i32, i32) {
    %c0_i32 = arith.constant 0 : i32
    %c0_i32_0 = arith.constant 0 : i32
    %c0_i32_1 = arith.constant 0 : i32
    return %c0_i32, %c0_i32_0 : i32, i32
  }
  func.func @transform_3(%arg0: i32) -> (i32, i32) {
    %c0_i32 = arith.constant 0 : i32
    %c0_i32_0 = arith.constant 0 : i32
    %c0_i32_1 = arith.constant 0 : i32
    return %c0_i32, %c0_i32_0 : i32, i32
  }
  func.func @transform_4(%arg0: i32) -> (i32, i32) {
    %c0_i32 = arith.constant 0 : i32
    %c0_i32_0 = arith.constant 0 : i32
    %c0_i32_1 = arith.constant 0 : i32
    return %c0_i32, %c0_i32_0 : i32, i32
  }
  func.func @transform_5(%arg0: i32) -> (i32, i32) {
    %c0_i32 = arith.constant 0 : i32
    %c0_i32_0 = arith.constant 0 : i32
    %c0_i32_1 = arith.constant 0 : i32
    return %c0_i32, %c0_i32_0 : i32, i32
  }
  func.func @transform_6(%arg0: i32) -> (i32, i32) {
    %c0_i32 = arith.constant 0 : i32
    %c0_i32_0 = arith.constant 0 : i32
    return %c0_i32, %arg0 : i32, i32
  }
}

</mosaic_0001>

<bundles_post_ra>
// kernel: tpu_custom_call.1
= control target key start
LH: loop header
LB: loop body
LE: loop exit
PB: predicated region body
PF: predicated region fallthrough
CT: control target
= control target key end

     0   :  { %11 = vsyncpa [#allocation3], 0  ;;  %s515_s0 = inlined_call_operand.vmem [shape: f32[8,32], index: 0, kind: input, shape index: {}]   ;;  %s516_s1 = inlined_call_operand.hbm [shape: bf16[32,128], index: 1, kind: input, shape index: {}]   ;;  %s517_s2 = inlined_call_operand.hbm [shape: bf16[128,128], index: 2, kind: input, shape index: {}]   ;;  %s518_s3 = inlined_call_operand.vmem [shape: bf16[8,128], index: 3, kind: input, shape index: {}]   ;;  %s519_s4 = inlined_call_operand.vmem [shape: f32[2,128], index: 4, kind: input, shape index: {}]   ;;  %s520_s5 = inlined_call_operand.vmem [shape: f32[8,1], index: 5, kind: input, shape index: {}]   ;;  %s521_s6 = inlined_call_operand.hbm [shape: f32[8,8], index: 6, kind: output, shape index: {}]  }
   0x1   :  { %12 = vsyncpa [#allocation6], 0 }
   0x2   :  { %13 = vsyncpa [#allocation4], 0  ;;  %s445_s21 = smov [#allocation2]  }
   0x3   :  { %s21_s22 = sshll.u32 %s445_s21, 4  ;;  %s22_s22 = int_to_ptr.vmem [resolvable:$true] %s21_s22 }
   0x4   :  { %s387_s23 = scalar_lea.vmem %s22_s22, 256  ;;  %p392_p1 = scmp.lt.s32.totalorder %s22_s22, %s22_s22 }
   0x5   :  { %p388_p0 = scmp.ne.s32.totalorder %s22_s22, %s387_s23  ;;  %p393_p2 = scmp.lt.s32.totalorder %s387_s23, %s387_s23 }
   0x7   :  { %p394_p3 = por %p393_p2, %p392_p1 }
   0x9   :  { %p395_p4 = pnand %p394_p3, %p388_p0 }
   0xb   :  { %398 = shalt.err (!%p395_p4)
}
   0xc   :  { %s446_s24 = smov 64   ;;  %s447_s25 = smov 4  }
   0xd   :  { %27 = dma.hbm_to_vmem [thread:$0]  %s516_s1, 256, %s22_s22, [#allocation3], %s446_s24, %s446_s24, %s447_s25  }
   0xe   :  { %s448_s28 = smov [#allocation5]  }
   0xf   :  { %s33_s29 = sshll.u32 %s448_s28, 4  ;;  %s34_s29 = int_to_ptr.vmem [resolvable:$true] %s33_s29 }
  0x10   :  { %s407_s30 = scalar_lea.vmem %s34_s29, 1024  ;;  %p412_p6 = scmp.lt.s32.totalorder %s34_s29, %s34_s29 }
  0x11   :  { %p408_p5 = scmp.ne.s32.totalorder %s34_s29, %s407_s30  ;;  %p413_p7 = scmp.lt.s32.totalorder %s407_s30, %s407_s30 }
  0x13   :  { %p414_p8 = por %p413_p7, %p412_p6 }
  0x15   :  { %p415_p9 = pnand %p414_p8, %p408_p5 }
  0x17   :  { %418 = shalt.err (!%p415_p9)
}
  0x18   :  { %39 = dma.hbm_to_vmem [thread:$0]  %s517_s2, 1024, %s34_s29, [#allocation6], %s446_s24, %s446_s24, %s447_s25  }
  0x19   :  { %439 = dma.done.wait [#allocation3], 256  }
  0x1a   :  { %440 = vsyncadd [#allocation3], 4294967040 }
  0x1b   :  { %441 = dma.done.wait [#allocation6], 1024  }
  0x1c   :  { %442 = vsyncadd [#allocation6], 4294966272  ;;  %v449_v0 = vmov 0.0   ;;  %vm450_vm0 = vmmov 0   ;;  %v369_v1 = vld [vmem:[#allocation2 + $0x8] sm:$0xff]   ;;  %v370_v2 = vld [vmem:[#allocation2] sm:$0xff]  }
  0x1d   :  { %326 = vmatprep.subr.bf16.mxu0 %v449_v0  ;;  %330 = vmatprep.mubr.msk.bf16.mxu0 %vm450_vm0, %v449_v0  ;;  %v53_v3 = vld [vmem:[%s515_s0] sm:$0xff]  ;;  %v371_v4 = vld [vmem:[#allocation5 + $0x38] sm:$0xff]   ;;  %vm78_vm1 = vcmask 261120   ;;  %v373_v7 = vld [vmem:[#allocation5 + $0x28] sm:$0xff]   ;;  %v451_v22 = vmov 0   ;;  %vm281_vm2 = vcmask 64512  }
  0x1e   :  { %334 = vmatprep.subr.bf16.mxu1 %v449_v0  ;;  %350 = vmatprep.mubr.msk.bf16.mxu1 %vm450_vm0, %v449_v0  ;;  %v54_v5 = vpack.c.bf16 %v53_v3, %v53_v3  ;;  %v372_v6 = vld [vmem:[#allocation5 + $0x30] sm:$0xff]   ;;  %v374_v8 = vld [vmem:[#allocation5 + $0x20] sm:$0xff]   ;;  %v375_v9 = vld [vmem:[#allocation5 + $0x18] sm:$0xff]  }
  0x1f   :  { %327 = vmatpush3.bf16.msra.mxu0 %v369_v1  ;;  %335 = vmatpush3.bf16.msra.mxu1 %v371_v4  ;;  %v376_v10 = vld [vmem:[#allocation5 + $0x10] sm:$0xff]   ;;  %v377_v11 = vld [vmem:[#allocation5 + $0x8] sm:$0xff]   ;;  %v378_v12 = vld [vmem:[#allocation5] sm:$0xff]  }
  0x20   :  { %328 = vmatprep.subr.bf16.mxu0 %v449_v0  ;;  %336 = vmatprep.subr.bf16.mxu1 %v449_v0  ;;  %v299_v13 = vld [vmem:[%s519_s4] ss:$0 sm:$0xff]  ;;  %v303_v23 = vld [vmem:[%s519_s4 + $0x1] ss:$0 sm:$0xff] }
  0x21   :  { %v57_v21 = vld [vmem:[%s520_s5] sm:$0xff]  ;;  %368 = vset.pattern.permute.xlu0 %v451_v22  ;;  %s452_s5 = smov [#allocation7]  }
  0x22   :  { %238 = vperm.xlu0 %368, %v57_v21   ;;  %v234_v32 = vld [vmem:[%s518_s3] sm:$0xf]  ;;  %s289_s16 = sshll.u32 %s452_s5, 4  ;;  %s290_s16 = int_to_ptr.vmem [resolvable:$true] %s289_s16 }
  0x23   :  { %329 = vmatpush3.bf16.msra.mxu0 %v370_v2  ;;  %337 = vmatpush3.bf16.msra.mxu1 %v372_v6  ;;  %s419_s4 = scalar_lea.vmem %s290_s16, 128  ;;  %p424_p11 = scmp.lt.s32.totalorder %s290_s16, %s290_s16 }
  0x24   :  { %354 = vmatprep.subr.bf16.mxu0 %v449_v0  ;;  %338 = vmatprep.subr.bf16.mxu1 %v449_v0  ;;  %p420_p10 = scmp.ne.s32.totalorder %s290_s16, %s419_s4  ;;  %p425_p12 = scmp.lt.s32.totalorder %s419_s4, %s419_s4 }
  0x26   :  { %331 = vmatmul.mubr.msk.bf16.vlgmr.msra.gmra.mxu0 %vm78_vm1, %v54_v5  ;;  %p426_p13 = por %p425_p12, %p424_p11 }
  0x27   :  { %356 = vmatprep.mubr.msk.bf16.mxu0 %vm450_vm0, %v449_v0  ;;  %339 = vmatpush3.bf16.msra.mxu1 %v373_v7 }
  0x28   :  { %340 = vmatprep.subr.bf16.mxu1 %v449_v0  ;;  %p427_p0 = pnand %p426_p13, %p420_p10 }
  0x2b   :  { %341 = vmatpush3.bf16.msra.mxu1 %v374_v8 }
  0x2c   :  { %342 = vmatprep.subr.bf16.mxu1 %v449_v0 }
  0x2f   :  { %343 = vmatpush3.bf16.msra.mxu1 %v375_v9 }
  0x30   :  { %344 = vmatprep.subr.bf16.mxu1 %v449_v0 }
  0x33   :  { %345 = vmatpush3.bf16.msra.mxu1 %v376_v10 }
  0x34   :  { %346 = vmatprep.subr.bf16.mxu1 %v449_v0 }
  0x37   :  { %347 = vmatpush3.bf16.msra.mxu1 %v377_v11 }
  0x38   :  { %348 = vmatprep.subr.bf16.mxu1 %v449_v0 }
  0x3b   :  { %349 = vmatpush3.bf16.msra.mxu1 %v378_v12 }
  0x9d   :  { %v239_v33 = vpop.permute.xlu0 %238 }
  0xe6   :  { %v116_v14 = vpop.f32.mrf.mxu0 }
  0xe7   :  { %v117_v15 = vadd.f32 %v299_v13, %v116_v14 }
  0xe8   :  { %v332_v16 = vpop.f32.mrf.mxu0 }
  0xe9   :  { %v122_v17 = vmax.f32 %v117_v15, 0.0 }
  0xea   :  { %v119_v18 = vpop.f32.mrf.mxu0 }
  0xeb   :  { %v123_v19 = vpack.c.bf16 %v122_v17, %v122_v17 }
  0xec   :  { %v333_v20 = vpop.f32.mrf.mxu0 }
  0xed   :  { %351 = vmatmul.mubr.bf16.vlgmr.msra.gmra.mxu1 %v123_v19 }
 0x1ad   :  { %v226_v24 = vpop.f32.mrf.mxu1 }
 0x1ae   :  { %v227_v25 = vadd.f32 %v303_v23, %v226_v24 }
 0x1af   :  { %v352_v26 = vpop.f32.mrf.mxu1 }
 0x1b0   :  { %v232_v27 = vmax.f32 %v227_v25, 0.0 }
 0x1b1   :  { %v229_v28 = vpop.f32.mrf.mxu1 }
 0x1b2   :  { %v233_v29 = vadd.f32 %v232_v27, %v122_v17 }
 0x1b3   :  { %v353_v30 = vpop.f32.mrf.mxu1 }
 0x1b4   :  { %v235_v31 = vpack.c.bf16 %v233_v29, %v233_v29 }
 0x1b6   :  { %355 = vmatpush3.bf16.xpose.msra.mxu0 %v235_v31 }
 0x1bd   :  { %357 = vmatmul.mubr.bf16.vlgmr.msra.gmra.mxu0 %v234_v32 }
 0x27d   :  { %v275_v34 = vpop.f32.mrf.mxu0 }
 0x27e   :  { %v276_v35 = vadd.f32 %v275_v34, %v239_v33 }
 0x27f   :  { %v358_v36 = vpop.f32.mrf.mxu0 }
 0x280   :  { %282 = vst.msk [vmem:[#allocation7] sm:$0xff] %vm281_vm2, %v276_v35 }
 0x281   :  { %v278_v37 = vpop.f32.mrf.mxu0 }
 0x282   :  { %430 = shalt.err (!%p427_p0)
}
 0x283   :  { %292 = dma.vmem_to_hbm [thread:$0]  %s290_s16, 128, %s521_s6, [#allocation4]   ;;  %v359_v38 = vpop.f32.mrf.mxu0 }
 0x284   :  { %443 = dma.done.wait [#allocation4], 128  }
 0x285   :  { %444 = vsyncadd [#allocation4], 4294967168 }
 0x286   :  { %296 = vsyncpa [#allocation3], 1 }
 0x287   :  { %297 = vsyncpa [#allocation6], 1 }
 0x288   :  { %298 = vsyncpa [#allocation4], 1 }

</bundles_post_ra>
